<compile_context>
chip_gen: v7x
topology: tpu7x:2x2x1
jax: 0.10.0
libtpu: 0.0.40
codegen_flags: <defaults>
</compile_context>

<pallas_src>
import jax
import jax.numpy as jnp
from jax.experimental import pallas as pl
from jax.experimental.pallas import tpu as pltpu


def _recon_loss_kernel(w_ref, img_ref, coarse_ref, recon_ref, mask_ref, out_ref):
    """One grid step = one (batch, spatial-tile) block.

    w_ref   : SMEM (B, 4) per-batch combined weights
              [runhole/(1-mm), rhole/mm - runhole/(1-mm),
               cunhole/(1-mm), chole/mm - cunhole/(1-mm)]
    img/coarse/recon : VMEM (1, C, S_TILE, 128)  (or (1, C, HW) fallback)
    mask    : VMEM (1, Cm, S_TILE, 128), Cm in {1, C}; broadcasts over C
    out_ref : VMEM (1, 1, 1) per-batch accumulator, resident across the
              spatial-tile (reduction) grid axis.
    """
    b = pl.program_id(0)
    s = pl.program_id(1)

    @pl.when(s == 0)
    def _():
        out_ref[...] = jnp.zeros_like(out_ref)

    img = img_ref[...].astype(jnp.float32)
    recon = recon_ref[...].astype(jnp.float32)
    coarse = coarse_ref[...].astype(jnp.float32)
    mask = mask_ref[...].astype(jnp.float32)

    w_r0 = w_ref[b, 0]
    w_r1 = w_ref[b, 1]
    w_c0 = w_ref[b, 2]
    w_c1 = w_ref[b, 3]

    # Per-pixel weights computed once on the (possibly single-channel) mask
    # block; they broadcast across image channels in the products below.
    wr = w_r0 + w_r1 * mask
    wc = w_c0 + w_c1 * mask

    val = jnp.abs(img - recon) * wr + jnp.abs(img - coarse) * wc
    out_ref[...] = out_ref[...] + jnp.sum(val)


def _pick_row_tile(rows, max_rows):
    """Largest multiple-of-8 divisor of `rows` that fits the VMEM budget;
    falls back to a layout-legal alternative when none exists."""
    if rows <= max_rows:
        return rows
    divs = [t for t in range(8, rows, 8) if rows % t == 0]
    fits = [t for t in divs if t <= max_rows]
    if fits:
        return fits[-1]
    if divs:
        return divs[0]
    return rows


def recon_loss(imgs, coarse_imgs, recon_imgs, masks, *,
               chole_alpha, cunhole_alpha, rhole_alpha, runhole_alpha,
               target_block_bytes=1 << 20):
    B, C, H, W = imgs.shape
    Bm, Cm, Hm, Wm = masks.shape
    assert (Bm, Hm, Wm) == (B, H, W) and Cm in (1, C)
    HW = H * W
    # element count of the broadcast |diff| * mask tensor, as torch.mean sees it
    n_total = float(B * max(C, Cm) * HW)

    # ---- per-batch weights, hoisted out of the kernel (mask is the smallest
    # input).  Exactly mirrors the torch forward:
    #   |d_r|*m*rhole/mm + |d_r|*(1-m)*runhole/(1-mm)
    # + |d_c|*m*chole/mm + |d_c|*(1-m)*cunhole/(1-mm)
    # rewritten as |d_r|*(w_r0 + w_r1*m) + |d_c|*(w_c0 + w_c1*m).
    mm = masks.reshape(B, -1).astype(jnp.float32).mean(axis=1)        # (B,)
    inv_h = 1.0 / mm          # inf if mask all-zero (same behavior as reference)
    inv_u = 1.0 / (1.0 - mm)  # inf if mask all-one  (same behavior as reference)
    w_r0 = runhole_alpha * inv_u
    w_r1 = rhole_alpha * inv_h - runhole_alpha * inv_u
    w_c0 = cunhole_alpha * inv_u
    w_c1 = chole_alpha * inv_h - cunhole_alpha * inv_u
    weights = jnp.stack([w_r0, w_r1, w_c0, w_c1], axis=1).astype(jnp.float32)

    lanes = 128
    if HW % lanes == 0:
        # Sublane/lane-dense layout: (B, C, rows, 128), tiled along rows.
        rows = HW // lanes
        bytes_per_row = C * lanes * 4
        max_rows = max(1, target_block_bytes // bytes_per_row)
        s_tile = _pick_row_tile(rows, max_rows)
        grid = (B, rows // s_tile)
        img_shape = (B, C, rows, lanes)
        msk_shape = (B, Cm, rows, lanes)
        img_spec = pl.BlockSpec((1, C, s_tile, lanes), lambda b, s, w: (b, 0, s, 0))
        msk_spec = pl.BlockSpec((1, Cm, s_tile, lanes), lambda b, s, w: (b, 0, s, 0))
    else:
        # Fallback for spatial sizes not divisible by 128: one full spatial
        # block per batch element (block dims equal to full array dims).
        grid = (B, 1)
        img_shape = (B, C, HW)
        msk_shape = (B, Cm, HW)
        img_spec = pl.BlockSpec((1, C, HW), lambda b, s, w: (b, 0, 0))
        msk_spec = pl.BlockSpec((1, Cm, HW), lambda b, s, w: (b, 0, 0))

    imgs_r = imgs.reshape(img_shape)
    coarse_r = coarse_imgs.reshape(img_shape)
    recon_r = recon_imgs.reshape(img_shape)
    masks_r = masks.reshape(msk_shape)

    partial_sums = pl.pallas_call(
        _recon_loss_kernel,
        out_shape=jax.ShapeDtypeStruct((B, 1, 1), jnp.float32),
        grid_spec=pltpu.PrefetchScalarGridSpec(
            num_scalar_prefetch=1,               # (B, 4) weight table -> SMEM
            grid=grid,
            in_specs=[img_spec, img_spec, img_spec, msk_spec],
            out_specs=pl.BlockSpec((1, 1, 1), lambda b, s, w: (b, 0, 0)),
        ),
        compiler_params=pltpu.CompilerParams(
            dimension_semantics=("parallel", "arbitrary")),
    )(weights, imgs_r, coarse_r, recon_r, masks_r)

    return jnp.sum(partial_sums) / n_total


if __name__ == "__main__":
    key = jax.random.PRNGKey(0)
    k1, k2, k3, k4 = jax.random.split(key, 4)

    B, C, H, W = 2, 4, 16, 16
    imgs = jax.random.normal(k1, (B, C, H, W), jnp.float32)
    coarse_imgs = jax.random.normal(k2, (B, C, H, W), jnp.float32)
    recon_imgs = jax.random.normal(k3, (B, C, H, W), jnp.float32)
    masks = (jax.random.uniform(k4, (B, 1, H, W)) > 0.5).astype(jnp.float32)

    # deterministic "parameters" (alphas from __init__)
    alphas = dict(chole_alpha=1.2, cunhole_alpha=1.2,
                  rhole_alpha=1.4, runhole_alpha=1.4)

    loss = recon_loss(imgs, coarse_imgs, recon_imgs, masks, **alphas)
    jax.block_until_ready(loss)

    # pure-JAX reference (mirrors the torch forward exactly)
    mm = masks.reshape(B, -1).mean(axis=1).reshape(-1, 1, 1, 1)
    ref = (alphas["rhole_alpha"] * jnp.mean(jnp.abs(imgs - recon_imgs) * masks / mm)
           + alphas["runhole_alpha"] * jnp.mean(jnp.abs(imgs - recon_imgs) * (1.0 - masks) / (1.0 - mm))
           + alphas["chole_alpha"] * jnp.mean(jnp.abs(imgs - coarse_imgs) * masks / mm)
           + alphas["cunhole_alpha"] * jnp.mean(jnp.abs(imgs - coarse_imgs) * (1.0 - masks) / (1.0 - mm)))

    assert abs(float(loss) - float(ref)) < 2e-4 * max(1.0, abs(float(ref))), (
        float(loss), float(ref))
    print("KERNEL_OK")
</pallas_src>

<mosaic_0001>
module attributes {stable_mosaic.version = 11 : i64} {
  func.func @_recon_loss_kernel(%arg0: i32, %arg1: i32, %arg2: memref<2x4xf32, #tpu.memory_space<smem>>, %arg3: memref<1x4x2x128xf32, #tpu.memory_space<vmem>>, %arg4: memref<1x4x2x128xf32, #tpu.memory_space<vmem>>, %arg5: memref<1x4x2x128xf32, #tpu.memory_space<vmem>>, %arg6: memref<1x1x2x128xf32, #tpu.memory_space<vmem>>, %arg7: memref<1x1x1xf32, #tpu.memory_space<vmem>>) attributes {dimension_semantics = [#tpu.dimension_semantics<parallel>, #tpu.dimension_semantics<arbitrary>], iteration_bounds = array<i64: 2, 1>, scalar_prefetch = 1 : i64, scratch_operands = 0 : i64, tpu.core_type = #tpu.core_type<tc>, window_params = [{transform_indices = @transform_0, window_bounds = array<i64: 1, 4, 2, 128>}, {transform_indices = @transform_1, window_bounds = array<i64: 1, 4, 2, 128>}, {transform_indices = @transform_2, window_bounds = array<i64: 1, 4, 2, 128>}, {transform_indices = @transform_3, window_bounds = array<i64: 1, 1, 2, 128>}, {transform_indices = @transform_4, window_bounds = array<i64: 1, 1, 1>}]} {
    %c0_i32 = arith.constant 0 : i32
    %0 = arith.cmpi eq, %arg1, %c0_i32 : i32
    %1 = arith.extui %0 : i1 to i32
    %c0_i32_0 = arith.constant 0 : i32
    %2 = arith.cmpi ne, %1, %c0_i32_0 : i32
    scf.if %2 {
      %cst_23 = arith.constant 0.000000e+00 : f32
      %40 = vector.broadcast %cst_23 : f32 to vector<1x1x1xf32>
      %c0_24 = arith.constant 0 : index
      %c0_25 = arith.constant 0 : index
      %c0_26 = arith.constant 0 : index
      %41 = vector.load %arg7[%c0_24, %c0_25, %c0_26] : memref<1x1x1xf32, #tpu.memory_space<vmem>>, vector<1x1x1xf32>
      tpu.vector_store %arg7[%c0_24, %c0_25, %c0_26], %40 {strides = array<i32>} : memref<1x1x1xf32, #tpu.memory_space<vmem>>, vector<1x1x1xf32>,
    } else {
    }
    %c0 = arith.constant 0 : index
    %c0_1 = arith.constant 0 : index
    %c0_2 = arith.constant 0 : index
    %c0_3 = arith.constant 0 : index
    %3 = vector.load %arg3[%c0, %c0_1, %c0_2, %c0_3] : memref<1x4x2x128xf32, #tpu.memory_space<vmem>>, vector<1x4x2x128xf32>
    %c0_4 = arith.constant 0 : index
    %c0_5 = arith.constant 0 : index
    %c0_6 = arith.constant 0 : index
    %c0_7 = arith.constant 0 : index
    %4 = vector.load %arg5[%c0_4, %c0_5, %c0_6, %c0_7] : memref<1x4x2x128xf32, #tpu.memory_space<vmem>>, vector<1x4x2x128xf32>
    %c0_8 = arith.constant 0 : index
    %c0_9 = arith.constant 0 : index
    %c0_10 = arith.constant 0 : index
    %c0_11 = arith.constant 0 : index
    %5 = vector.load %arg4[%c0_8, %c0_9, %c0_10, %c0_11] : memref<1x4x2x128xf32, #tpu.memory_space<vmem>>, vector<1x4x2x128xf32>
    %c0_12 = arith.constant 0 : index
    %c0_13 = arith.constant 0 : index
    %c0_14 = arith.constant 0 : index
    %c0_15 = arith.constant 0 : index
    %6 = vector.load %arg6[%c0_12, %c0_13, %c0_14, %c0_15] : memref<1x1x2x128xf32, #tpu.memory_space<vmem>>, vector<1x1x2x128xf32>
    %7 = arith.index_cast %arg0 : i32 to index
    %c0_16 = arith.constant 0 : index
    %8 = memref.load %arg2[%7, %c0_16] : memref<2x4xf32, #tpu.memory_space<smem>>
    %9 = arith.index_cast %arg0 : i32 to index
    %c1 = arith.constant 1 : index
    %10 = memref.load %arg2[%9, %c1] : memref<2x4xf32, #tpu.memory_space<smem>>
    %11 = arith.index_cast %arg0 : i32 to index
    %c2 = arith.constant 2 : index
    %12 = memref.load %arg2[%11, %c2] : memref<2x4xf32, #tpu.memory_space<smem>>
    %13 = arith.index_cast %arg0 : i32 to index
    %c3 = arith.constant 3 : index
    %14 = memref.load %arg2[%13, %c3] : memref<2x4xf32, #tpu.memory_space<smem>>
    %15 = vector.broadcast %10 : f32 to vector<1x1x2x128xf32>
    %16 = arith.mulf %15, %6 : vector<1x1x2x128xf32>
    %17 = vector.broadcast %8 : f32 to vector<1x1x2x128xf32>
    %18 = arith.addf %17, %16 : vector<1x1x2x128xf32>
    %19 = vector.broadcast %14 : f32 to vector<1x1x2x128xf32>
    %20 = arith.mulf %19, %6 : vector<1x1x2x128xf32>
    %21 = vector.broadcast %12 : f32 to vector<1x1x2x128xf32>
    %22 = arith.addf %21, %20 : vector<1x1x2x128xf32>
    %23 = arith.subf %3, %4 : vector<1x4x2x128xf32>
    %24 = math.absf %23 : vector<1x4x2x128xf32>
    %25 = vector.broadcast %18 : vector<1x1x2x128xf32> to vector<1x4x2x128xf32>
    %26 = arith.mulf %24, %25 : vector<1x4x2x128xf32>
    %27 = arith.subf %3, %5 : vector<1x4x2x128xf32>
    %28 = math.absf %27 : vector<1x4x2x128xf32>
    %29 = vector.broadcast %22 : vector<1x1x2x128xf32> to vector<1x4x2x128xf32>
    %30 = arith.mulf %28, %29 : vector<1x4x2x128xf32>
    %31 = arith.addf %26, %30 : vector<1x4x2x128xf32>
    %c0_17 = arith.constant 0 : index
    %c0_18 = arith.constant 0 : index
    %c0_19 = arith.constant 0 : index
    %32 = vector.load %arg7[%c0_17, %c0_18, %c0_19] : memref<1x1x1xf32, #tpu.memory_space<vmem>>, vector<1x1x1xf32>
    %33 = vector.shape_cast %31 : vector<1x4x2x128xf32> to vector<1x1x4x2x128xf32>
    %cst = arith.constant dense<0.000000e+00> : vector<1xf32>
    %34 = vector.multi_reduction <add>, %33, %cst [1, 2, 3, 4] : vector<1x1x4x2x128xf32> to vector<1xf32>
    %35 = vector.shape_cast %34 : vector<1xf32> to vector<1x1x1x1x1xf32>
    %36 = vector.extract %35[0, 0, 0, 0, 0] : f32 from vector<1x1x1x1x1xf32>
    %37 = vector.broadcast %36 : f32 to vector<1x1x1xf32>
    %38 = arith.addf %32, %37 : vector<1x1x1xf32>
    %c0_20 = arith.constant 0 : index
    %c0_21 = arith.constant 0 : index
    %c0_22 = arith.constant 0 : index
    %39 = vector.load %arg7[%c0_20, %c0_21, %c0_22] : memref<1x1x1xf32, #tpu.memory_space<vmem>>, vector<1x1x1xf32>
    tpu.vector_store %arg7[%c0_20, %c0_21, %c0_22], %38 {strides = array<i32>} : memref<1x1x1xf32, #tpu.memory_space<vmem>>, vector<1x1x1xf32>,
    return
  }
  func.func @transform_0(%arg0: i32, %arg1: i32, %arg2: memref<2x4xf32, #tpu.memory_space<smem>>) -> (i32, i32, i32, i32) {
    %c0_i32 = arith.constant 0 : i32
    %c0_i32_0 = arith.constant 0 : i32
    %c0_i32_1 = arith.constant 0 : i32
    return %arg0, %c0_i32, %arg1, %c0_i32_0 : i32, i32, i32, i32
  }
  func.func @transform_1(%arg0: i32, %arg1: i32, %arg2: memref<2x4xf32, #tpu.memory_space<smem>>) -> (i32, i32, i32, i32) {
    %c0_i32 = arith.constant 0 : i32
    %c0_i32_0 = arith.constant 0 : i32
    %c0_i32_1 = arith.constant 0 : i32
    return %arg0, %c0_i32, %arg1, %c0_i32_0 : i32, i32, i32, i32
  }
  func.func @transform_2(%arg0: i32, %arg1: i32, %arg2: memref<2x4xf32, #tpu.memory_space<smem>>) -> (i32, i32, i32, i32) {
    %c0_i32 = arith.constant 0 : i32
    %c0_i32_0 = arith.constant 0 : i32
    %c0_i32_1 = arith.constant 0 : i32
    return %arg0, %c0_i32, %arg1, %c0_i32_0 : i32, i32, i32, i32
  }
  func.func @transform_3(%arg0: i32, %arg1: i32, %arg2: memref<2x4xf32, #tpu.memory_space<smem>>) -> (i32, i32, i32, i32) {
    %c0_i32 = arith.constant 0 : i32
    %c0_i32_0 = arith.constant 0 : i32
    %c0_i32_1 = arith.constant 0 : i32
    return %arg0, %c0_i32, %arg1, %c0_i32_0 : i32, i32, i32, i32
  }
  func.func @transform_4(%arg0: i32, %arg1: i32, %arg2: memref<2x4xf32, #tpu.memory_space<smem>>) -> (i32, i32, i32) {
    %c0_i32 = arith.constant 0 : i32
    %c0_i32_0 = arith.constant 0 : i32
    %c0_i32_1 = arith.constant 0 : i32
    return %arg0, %c0_i32, %c0_i32_0 : i32, i32, i32
  }
}

</mosaic_0001>

<bundles_post_ra>
// kernel: tpu_custom_call.1
= control target key start
LH: loop header
LB: loop body
LE: loop exit
PB: predicated region body
PF: predicated region fallthrough
CT: control target
= control target key end

     0   :  { %s1097_s0 = inlined_call_operand.hbm [shape: f32[2,4], index: 0, kind: input, shape index: {}]   ;;  %s1098_s1 = inlined_call_operand.hbm [shape: f32[2,4,2,128], index: 1, kind: input, shape index: {}]   ;;  %s1099_s2 = inlined_call_operand.hbm [shape: f32[2,4,2,128], index: 2, kind: input, shape index: {}]   ;;  %s1100_s3 = inlined_call_operand.hbm [shape: f32[2,4,2,128], index: 3, kind: input, shape index: {}]   ;;  %s1101_s4 = inlined_call_operand.vmem [shape: f32[2,1,2,128], index: 4, kind: input, shape index: {}]   ;;  %s1102_s5 = inlined_call_operand.vmem [shape: f32[2,1,1], index: 5, kind: output, shape index: {}]  }
   0x1   :  { %s656_s20 = scalar_lea.hbm %s1097_s0, 32 }
   0x2   :  { %p657_p0 = scmp.ne.s32.totalorder %s1097_s0, %s656_s20  ;;  %p660_p1 = scmp.lt.u32.totalorder %s656_s20, %s1097_s0 }
   0x4   :  { %p662_p2 = pnand %p660_p1, %p657_p0 }
   0x6   :  { %665 = shalt.err (!%p662_p2)  }
   0x7   :  { %s814_s25 = smov [#allocation3]  }
   0x8   :  { %11 = dma.hbm_to_smem %s1097_s0, 32, %s814_s25, [#allocation2] }
   0x9   :  { %780 = dma.done.wait [#allocation2], 32 }
   0xa   :  { %781 = vsyncadd [#allocation2], 4294967264 }
   0xb   :  { %13 = sfence }
   0xc   :  { %14 = vsyncpa [#allocation5], 0 }
   0xd   :  { %16 = vsyncpa [#allocation5 + $0x1], 0 }
   0xe   :  { %17 = vsyncpa [#allocation7], 0 }
   0xf   :  { %19 = vsyncpa [#allocation7 + $0x1], 0  ;;  %s863_s28 = smov 0   ;;  %s865_s29 = smov 0  }
  0x10   :  { %s867_s30 = smov 0   ;;  %s869_s6 = smov 0  }
  0x11   :  { %s871_s7 = smov 0   ;;  %s873_s8 = smov 0  }
  0x12 LB: > { %s1104_s0 = sadd.s32 4294967295, %s812_s8   ;;  %s37_s9 = sadd.s32 1, %s808_s7  ;;  %s812_s8 = sphi %s873_s8, %s25_s8   ;;  %s808_s7 = sphi %s871_s7, %s1120_s7   ;;  %s804_s6 = sphi %s869_s6, %s1119_s6   ;;  %s800_s30 = sphi %s867_s30, %s1118_s30   ;;  %s796_s29 = sphi %s865_s29, %s1117_s29   ;;  %s792_s28 = sphi %s863_s28, %s1116_s28  }
  0x13   : > { %p39_p3 = scmp.ge.s32.totalorder %s37_s9, 2  ;;  %s46_s10 = sadd.s32 1, %s800_s30 }
  0x14   : > { %p53_p4 = scmp.ne.s32.totalorder %s800_s30, %s796_s29  ;;  %p54_p5 = scmp.eq.s32.totalorder %s812_s8, 0 }
  0x15   : > { %s1122_s9 = smov (%p39_p3, %s37_s9), 0  ;;  %p59_p7 = scmp.ne.s32.totalorder %s796_s29, %s792_s28 }
  0x16   : > { %p55_p6 = por %p54_p5, %p53_p4  ;;  %s41_s11 = ssub.s32 %s808_s7, %s1122_s9 }
  0x17   : > { %p60_p8 = scmp.eq.s32.totalorder %s1104_s0, 0  ;;  %p44_p9 = scmp.eq.s32.totalorder %s41_s11, 0 }
  0x18   : > { %p603_p11 = scmp.lt.s32.totalorder %s812_s8, 2  ;;  %s193_s14 = sand.u32 1, %s800_s30  }
  0x19   : > { %p904_p10 = por %p60_p8, %p59_p7  ;;  %s914_s15 = sshll.u32 %s808_s7, 7 }
  0x1a   : > { %s910_s13 = scalar_select %p44_p9, %s800_s30, %s46_s10  }
  0x1b   : > { %s1107_s12 = scalar_select %p904_p10, 1, 0 }
  0x1c   : > { %s918_s16 = sshll.u32 %s193_s14, 3  ;;  %p920_p12 = pnand %p603_p11, %p55_p6 }
  0x1d   : > { %s215_s18 = sand.u32 1, %s812_s8   ;;  %s929_s21 = scalar_lea.hbm %s1099_s2, %s914_s15 }
  0x1e   : > { %s219_s22 = scalar_lea.vmem [#allocation6], %s918_s16  ;;  %s935_s24 = scalar_lea.sflag [#allocation7], %s215_s18 }
  0x1f   : > { %s227_s23 = sshll.u32 %s219_s22, 4  ;;  %s666_s25 = scalar_lea.hbm %s929_s21, 128  ;;  %s932_s23 = int_to_ptr.vmem [resolvable:$true] %s227_s23 }
  0x20   : > { %p667_p0 = scmp.ne.s32.totalorder %s929_s21, %s666_s25  ;;  %p941_p1 = pneg %p920_p12 }
  0x21   : > { %s671_s10 = scalar_lea.hbm %s1099_s2, 256  ;;  %p672_p4 = scmp.lt.u32.totalorder %s929_s21, %s1099_s2 }
  0x22   : > { %p669_p2 = pnand %p941_p1, %p667_p0  ;;  %p673_p5 = scmp.lt.u32.totalorder %s671_s10, %s666_s25 }
  0x23   : > { %p675_p7 = scmp.lt.u32.totalorder %s666_s25, %s929_s21 }
  0x24   : > { %p670_p3 = pneg %p669_p2  ;;  %p674_p6 = por %p673_p5, %p672_p4 }
  0x26   : > { %p676_p8 = por %p675_p7, %p674_p6 }
  0x28   : > { %p677_p9 = pnand %p676_p8, %p670_p3 }
  0x2a   : > { %680 = shalt.err (!%p677_p9)
}
  0x2b   : > { %s681_s18 = scalar_lea.vmem %s932_s23, 128  ;;  %s815_s20 = smov [#allocation6]  }
  0x2c   : > { %p682_p11 = scmp.ne.s32.totalorder %s932_s23, %s681_s18  ;;  %s686_s22 = sshll.u32 %s815_s20, 4  ;;  %s687_s22 = int_to_ptr.vmem [resolvable:$false] %s686_s22 }
  0x2d   : > { %s688_s27 = scalar_lea.vmem %s687_s22, 256  ;;  %p689_p13 = scmp.lt.s32.totalorder %s932_s23, %s687_s22 }
  0x2e   : > { %p684_p0 = pnand %p682_p11, %p941_p1  ;;  %p690_p10 = scmp.lt.s32.totalorder %s688_s27, %s681_s18 }
  0x30   : > { %p685_p2 = pneg %p684_p0  ;;  %p691_p4 = por %p690_p10, %p689_p13 }
  0x32   : > { %p692_p5 = pnand %p691_p4, %p685_p2 }
  0x34   : > { %695 = shalt.err (!%p692_p5)
}
  0x35   : > { %s1105_s25 = smov 32   ;;  %s817_s28 = smov 2  }
  0x36   : > { %599 = dma.hbm_to_vmem [thread:$0]  (!%p920_p12), %s929_s21, 128, %s932_s23, %s935_s24, %s1105_s25, %s1105_s25, %s817_s28  }
  0x37   : > { %p267_p10 = scmp.lt.s32.totalorder %s812_s8, 3  ;;  %p1110_p13 = scmp.ge.s32.totalorder %s812_s8, 1 }
  0x38   : > { %s979_s18 = scalar_lea.hbm %s1098_s1, %s914_s15  ;;  %s197_s20 = scalar_lea.vmem [#allocation4], %s918_s16 }
  0x39   : > { %p971_p3 = pnand %p1110_p13, %p267_p10  ;;  %s205_s22 = sshll.u32 %s197_s20, 4  ;;  %s982_s22 = int_to_ptr.vmem [resolvable:$true] %s205_s22 }
  0x3a   : > { %s986_s21 = scalar_lea.sflag [#allocation5], %s193_s14  ;;  %s696_s23 = scalar_lea.hbm %s979_s18, 128 }
  0x3b   : > { %s1111_s10 = scalar_select %p971_p3, 1, 0 }
  0x3c   : > { %p697_p6 = scmp.ne.s32.totalorder %s979_s18, %s696_s23  ;;  %s701_s19 = scalar_lea.hbm %s1098_s1, 256 }
  0x3d   : > { %p702_p9 = scmp.lt.u32.totalorder %s979_s18, %s1098_s1  ;;  %p703_p11 = scmp.lt.u32.totalorder %s701_s19, %s696_s23 }
  0x3e   : > { %p699_p7 = pnand %p697_p6, %p941_p1  ;;  %p705_p2 = scmp.lt.u32.totalorder %s696_s23, %s979_s18 }
  0x3f   : > { %p704_p0 = por %p703_p11, %p702_p9 }
  0x40   : > { %p700_p8 = pneg %p699_p7 }
  0x41   : > { %p706_p4 = por %p705_p2, %p704_p0 }
  0x43   : > { %p707_p5 = pnand %p706_p4, %p700_p8 }
  0x45   : > { %710 = shalt.err (!%p707_p5)
}
  0x46   : > { %s711_s14 = scalar_lea.vmem %s982_s22, 128  ;;  %s818_s20 = smov [#allocation4]  }
  0x47   : > { %p712_p10 = scmp.ne.s32.totalorder %s982_s22, %s711_s14  ;;  %s716_s27 = sshll.u32 %s818_s20, 4  ;;  %s717_s27 = int_to_ptr.vmem [resolvable:$false] %s716_s27 }
  0x48   : > { %s718_s0 = scalar_lea.vmem %s717_s27, 256  ;;  %p719_p7 = scmp.lt.s32.totalorder %s982_s22, %s717_s27 }
  0x49   : > { %p714_p13 = pnand %p712_p10, %p941_p1  ;;  %p720_p3 = scmp.lt.s32.totalorder %s718_s0, %s711_s14 }
  0x4b   : > { %p715_p6 = pneg %p714_p13  ;;  %p721_p9 = por %p720_p3, %p719_p7 }
  0x4d   : > { %p722_p11 = pnand %p721_p9, %p715_p6 }
  0x4f   : > { %725 = shalt.err (!%p722_p11)
}
  0x50   : > { %s1112_s25 = smov 32   ;;  %s1017_s19 = scalar_lea.hbm %s1100_s3, %s914_s15 }
  0x51   : > { %596 = dma.hbm_to_vmem [thread:$0]  (!%p920_p12), %s979_s18, 128, %s982_s22, %s986_s21, %s1112_s25, %s1112_s25, %s817_s28  }
  0x52   : > { %s241_s14 = scalar_lea.vmem [#allocation8], %s918_s16  ;;  %s726_s27 = scalar_lea.hbm %s1017_s19, 128 }
  0x53   : > { %s249_s20 = sshll.u32 %s241_s14, 4  ;;  %p727_p3 = scmp.ne.s32.totalorder %s1017_s19, %s726_s27  ;;  %s1020_s20 = int_to_ptr.vmem [resolvable:$true] %s249_s20 }
  0x54   : > { %s731_s22 = scalar_lea.hbm %s1100_s3, 256  ;;  %p732_p2 = scmp.lt.u32.totalorder %s1017_s19, %s1100_s3 }
  0x55   : > { %p729_p8 = pnand %p727_p3, %p941_p1  ;;  %p733_p4 = scmp.lt.u32.totalorder %s731_s22, %s726_s27 }
  0x56   : > { %p735_p10 = scmp.lt.u32.totalorder %s726_s27, %s1017_s19 }
  0x57   : > { %p730_p0 = pneg %p729_p8  ;;  %p734_p5 = por %p733_p4, %p732_p2 }
  0x59   : > { %p736_p13 = por %p735_p10, %p734_p5 }
  0x5b   : > { %p737_p6 = pnand %p736_p13, %p730_p0 }
  0x5d   : > { %740 = shalt.err (!%p737_p6)
}
  0x5e   : > { %s741_s16 = scalar_lea.vmem %s1020_s20, 128  ;;  %s819_s23 = smov [#allocation8]  }
  0x5f   : > { %p742_p7 = scmp.ne.s32.totalorder %s1020_s20, %s741_s16  ;;  %s746_s11 = sshll.u32 %s819_s23, 4  ;;  %s747_s11 = int_to_ptr.vmem [resolvable:$false] %s746_s11 }
  0x60   : > { %s748_s14 = scalar_lea.vmem %s747_s11, 256  ;;  %p749_p3 = scmp.lt.s32.totalorder %s1020_s20, %s747_s11 }
  0x61   : > { %p744_p9 = pnand %p742_p7, %p941_p1  ;;  %p750_p8 = scmp.lt.s32.totalorder %s748_s14, %s741_s16 }
  0x63   : > { %p745_p11 = pneg %p744_p9  ;;  %p751_p2 = por %p750_p8, %p749_p3 }
  0x65   : > { %p752_p4 = pnand %p751_p2, %p745_p11 }
  0x67   : > { %755 = shalt.err (!%p752_p4)
}
  0x68   : > { %602 = dma.hbm_to_vmem [thread:$0]  (!%p920_p12), %s1017_s19, 128, %s1020_s20, %s935_s24, %s1112_s25, %s1112_s25, %s817_s28  }
  0x69   : > { %p1113_p1 = scmp.ne.s32.totalorder %s1111_s10, 0 }
  0x6a   : > { %s273_s26 = sand.u32 (!%p1113_p1), 1, %s796_s29   ;;  %p1114_p0 = scmp.ne.s32.totalorder (!%p1113_p1), %s1107_s12, 0 }
  0x6b   : > { %271 = sbr.rel (%p1113_p1) target bundleno = 356 (0x164), region = 36  ;;  %s575_s27 = sshll.u32 (!%p1113_p1), %s273_s26, 3 }
  0x6c   : > { %s274_s0 = scalar_lea.sflag (!%p1113_p1), [#allocation5], %s273_s26  ;;  %s277_s18 = scalar_lea.vmem (!%p1113_p1), [#allocation4], %s575_s27 }
  0x72   : > { %783 = dma.done.wait (%p1114_p0), %s274_s0, 128  }
  0x73   : > { %785 = vsyncadd (%p1114_p0), %s274_s0, 4294967168  ;;  %s1115_s17 = sadd.s32 4294967295, %s812_s8   ;;  %s286_s24 = scalar_lea.vmem [#allocation6], %s575_s27 }
  0x74   : > { %s282_s22 = sand.u32 1, %s1115_s17  }
  0x75   : > { %s283_s21 = scalar_lea.sflag [#allocation7], %s282_s22 }
  0x76   : > { %787 = dma.done.wait (%p1114_p0), %s283_s21, 256  }
  0x77   : > { %789 = vsyncadd (%p1114_p0), %s283_s21, 4294967040  ;;  %p335_p12 = scmp.lt.s32.totalorder %s804_s6, 1  ;;  %s579_s28 = sshll.u32 %s804_s6, 7  ;;  %v351_v0 = vld [vmem:[%s277_s18] sm:$0x3]  ;;  %vm409_vm0 = vcmask 1041408  }
  0x78   : > { %s1065_s10 = sld [smem:[#allocation3 + %s579_s28]]  ;;  %s366_s25 = sadd.s32 1, %s579_s28  ;;  %v352_v1 = vld [vmem:[%s277_s18 + $0x2] sm:$0x3]  ;;  %v353_v2 = vld [vmem:[%s277_s18 + $0x4] sm:$0x3] }
  0x79   : > { %s1124_s6 = smov (!%p335_p12, %s804_s6), 1  ;;  %s367_s19 = sld [smem:[#allocation3 + %s366_s25]]  ;;  %v354_v3 = vld [vmem:[%s277_s18 + $0x6] sm:$0x3]  ;;  %v359_v8 = vld [vmem:[%s286_s24] sm:$0x3] }
  0x7a   : > { %s578_s20 = sshll.u32 %s1124_s6, 1  ;;  %s368_s15 = sadd.s32 2, %s579_s28  ;;  %v360_v9 = vld [vmem:[%s286_s24 + $0x2] sm:$0x3]  ;;  %v361_v10 = vld [vmem:[%s286_s24 + $0x4] sm:$0x3]  ;;  %v392_v20 = vsub.f32 %v351_v0, %v359_v8 }
  0x7b   : > { %s1068_s16 = sld [smem:[#allocation3 + %s368_s15]]  ;;  %s370_s12 = sadd.s32 3, %s579_s28  ;;  %v362_v12 = vld [vmem:[%s286_s24 + $0x6] sm:$0x3]  ;;  %v393_v21 = vsub.f32 %v352_v1, %v360_v9  ;;  %v394_v22 = vsub.f32 %v353_v2, %v361_v10  ;;  %vm349_vm1 = vcmask 0   ;;  %v820_v56 = vmov 0.0  }
  0x7c   : > { %s341_s14 = scalar_lea.vmem %s1101_s4, %s578_s20  ;;  %s295_s26 = scalar_lea.vmem [#allocation8], %s575_s27  ;;  %v395_v23 = vsub.f32 %v354_v3, %v362_v12  ;;  %v396_v31 = vand.u32 2147483647, %v392_v20 }
  0x7d   : > { %v355_v4 = vld [vmem:[%s295_s26] sm:$0x3]  ;;  %v356_v5 = vld [vmem:[%s295_s26 + $0x2] sm:$0x3]  ;;  %v357_v6 = vld [vmem:[%s295_s26 + $0x4] sm:$0x3]  ;;  %s344_s17 = scalar_lea.vmem %s1102_s5, %s1124_s6 }
  0x7e   : > { %v358_v7 = vld [vmem:[%s295_s26 + $0x6] sm:$0x3]  ;;  %v363_v13 = vld [vmem:[%s341_s14] sm:$0x3]  ;;  %s371_s0 = sld [smem:[#allocation3 + %s370_s12]]  ;;  %v374_v14 = vstv %s1065_s10  ;;  %v380_v15 = vsub.f32 %v351_v0, %v355_v4  ;;  %v381_v17 = vsub.f32 %v352_v1, %v356_v5  ;;  %v382_v18 = vsub.f32 %v353_v2, %v357_v6 }
  0x7f   : > { %v372_v11 = vstv %s367_s19  ;;  %v383_v19 = vsub.f32 %v354_v3, %v358_v7  ;;  %v397_v33 = vand.u32 2147483647, %v393_v21  ;;  %v398_v34 = vand.u32 2147483647, %v394_v22  ;;  %350 = vst.msk [vmem:[%s344_s17] sm:$0x1] %vm349_vm1, %v820_v56 }
  0x80   : > { %v373_v16 = vmul.f32 %v372_v11, %v363_v13  ;;  %v384_v25 = vand.u32 2147483647, %v380_v15  ;;  %v385_v26 = vand.u32 2147483647, %v381_v17  ;;  %v386_v27 = vand.u32 2147483647, %v382_v18 }
  0x81   : > { %v387_v28 = vand.u32 2147483647, %v383_v19  ;;  %v378_v30 = vstv %s1068_s16  ;;  %v399_v35 = vand.u32 2147483647, %v395_v23 }
  0x82   : > { %v375_v24 = vadd.f32 %v374_v14, %v373_v16 }
  0x84   : > { %v376_v29 = vstv %s371_s0  ;;  %v388_v36 = vmul.f32 %v384_v25, %v375_v24  ;;  %v389_v38 = vmul.f32 %v385_v26, %v375_v24  ;;  %v390_v39 = vmul.f32 %v386_v27, %v375_v24 }
  0x85   : > { %v377_v32 = vmul.f32 %v376_v29, %v363_v13  ;;  %v391_v40 = vmul.f32 %v387_v28, %v375_v24 }
  0x86   : > { %v408_v0 = vld [vmem:[%s344_s17] sm:$0x1] }
  0x87   : > { %v379_v37 = vadd.f32 %v378_v30, %v377_v32 }
  0x89   : > { %v400_v41 = vmul.f32 %v396_v31, %v379_v37  ;;  %v401_v42 = vmul.f32 %v397_v33, %v379_v37  ;;  %v402_v43 = vmul.f32 %v398_v34, %v379_v37  ;;  %v403_v44 = vmul.f32 %v399_v35, %v379_v37 }
  0x8b   : > { %v404_v45 = vadd.f32 %v400_v41, %v388_v36  ;;  %v405_v46 = vadd.f32 %v401_v42, %v389_v38  ;;  %v406_v47 = vadd.f32 %v402_v43, %v390_v39  ;;  %v407_v48 = vadd.f32 %v403_v44, %v391_v40 }
  0x8d   : > { %v410_v49 = vsel %vm409_vm0, %v404_v45, 0.0  ;;  %v411_v50 = vsel %vm409_vm0, %v405_v46, 0.0  ;;  %v413_v51 = vsel %vm409_vm0, %v406_v47, 0.0  ;;  %v415_v53 = vsel %vm409_vm0, %v407_v48, 0.0 }
  0x8e   : > { %v412_v52 = vadd.f32 %v411_v50, %v410_v49 }
  0x90   : > { %v414_v54 = vadd.f32 %v413_v51, %v412_v52 }
  0x92   : > { %v416_v55 = vadd.f32 %v415_v53, %v414_v54 }
  0x94   : > { %417 = vadd.xlane.f32.xlu0 %v416_v55 }
 0x121   : > { %v418_v57 = vpop.xlane.xlu0 %417 }
 0x122   : > { %v419_v58 = vrot.slane %v418_v57, 4 }
 0x124   : > { %v420_v59 = vadd.f32 %v419_v58, %v418_v57 }
 0x126   : > { %v421_v60 = vrot.slane %v420_v59, 2 }
 0x128   : > { %v422_v61 = vadd.f32 %v421_v60, %v420_v59 }
 0x12a   : > { %v423_v62 = vrot.slane %v422_v61, 1 }
 0x12c   : > { %v424_v63 = vadd.f32 %v423_v62, %v422_v61 }
 0x12e   : > { %585 = vpush %v424_v63 }
 0x15f   : > { %s586_s22 = spop %585 }
 0x160   : > { %v426_v1 = vstv %s586_s22 }
 0x161   : > { %v427_v2 = vadd.f32 %v426_v1, %v408_v0 }
 0x163   : > { %429 = vst.msk [vmem:[%s344_s17] sm:$0x1] %vm349_vm1, %v427_v2 }
 0x164 PF: > { %s25_s8 = sadd.s32 1, %s812_s8   ;;  %s1116_s28 = smov %s796_s29 }
 0x165   : > { %p22_p5 = scmp.ge.s32.totalorder %s25_s8, 4   ;;  %s1117_s29 = smov %s800_s30 }
 0x166   : > { %s1118_s30 = smov %s910_s13  ;;  %s1119_s6 = smov %s808_s7 }
 0x167   : > { %s1120_s7 = smov %s1122_s9  ;;  %24 = sbr.rel (!%p22_p5) target bundleno = 18 (0x12), region = 107 }
 0x16e   :  { %447 = vsyncpa [#allocation5], 1 }
 0x16f   :  { %449 = vsyncpa [#allocation5 + $0x1], 1 }
 0x170   :  { %450 = vsyncpa [#allocation7], 1 }
 0x171   :  { %452 = vsyncpa [#allocation7 + $0x1], 1 }

</bundles_post_ra>
